<compile_context>
chip_gen: v5e
topology: v5e:2x2
jax: 0.10.0
libtpu: 0.0.40
codegen_flags: <defaults>
</compile_context>

<pallas_src>
import jax
import jax.numpy as jnp
from jax.experimental import pallas as pl
from jax.experimental.pallas import tpu as pltpu


def gbp_kernel(x1_ref, x2_ref, wa_ref, wb_ref, b_ref, seg_ref, o1_ref, o2_ref):
    """One row tile of the lane-packed fused GBP forward.

    x1_ref, x2_ref : (TM, dp)    packed activations (dp = pack * D, native dtype)
    wa_ref         : (dp, dp)    block-diag W1a^T            (x1 -> h1)
    wb_ref         : (dp, 2*dp)  [block-diag W1b^T | block-diag W2^T]  (x2 -> [h1|h2])
    b_ref          : (1, dp)     b1 tiled `pack` times
    seg_ref        : (dp, dp)    segment-sum matrix (1 where same D-lane group), f32
    o1_ref, o2_ref : (TM, dp)    packed outputs (x1_rep, x2_rep)
    """
    dp = o1_ref.shape[-1]

    # x2 feeds both branches: one fused (TM, dp) @ (dp, 2*dp) MXU dot.
    hb = jnp.dot(x2_ref[...], wb_ref[...], preferred_element_type=jnp.float32)
    # x1 feeds only the h1 half: (TM, dp) @ (dp, dp) -- no explicit zero block.
    h1 = jnp.dot(x1_ref[...], wa_ref[...], preferred_element_type=jnp.float32)
    h1 = h1 + hb[:, :dp] + b_ref[...].astype(jnp.float32)
    h2 = hb[:, dp:]

    # Branch 1: LeakyReLU(0.1) -- dense 128-lane store.
    o1_ref[...] = jnp.where(h1 > 0.0, h1, 0.1 * h1).astype(o1_ref.dtype)

    # Branch 2: h2 * tanh(h2 / (||h2|| + 1e-8)); the per-original-row L2 norm is a
    # per-D-lane-group segmented sum, computed (and lane-broadcast) with one tiny
    # constant matmul on the otherwise idle MXU. tanh touches only the h2 lanes.
    nsq = jnp.dot(h2 * h2, seg_ref[...], preferred_element_type=jnp.float32)
    inv = pl.reciprocal(jnp.sqrt(nsq) + 1e-8, approx=False)   # exact: keeps 1e-5 tol
    o2_ref[...] = (h2 * jnp.tanh(h2 * inv)).astype(o2_ref.dtype)


def choose_pack(m, d):
    """Largest power-of-two lane-packing factor with pack*d <= 128 that divides m."""
    pack = 1
    while pack * 2 * d <= 128:
        pack *= 2
    while pack > 1 and m % pack != 0:
        pack //= 2
    return pack


def prepare_gbp_params(w1, b1, w2, pack):
    """One-time packing of torch-layout parameters (do at load time, not per call).

    w1: (D, 2D)  x1_out.weight (out, in)     b1: (D,)  x1_out.bias
    w2: (D, D)   x2_up.weight  (out, in)     pack: lane-packing factor (e.g. 4 for D=32)
    Returns (wa, wb, b1p, seg) as described in gbp_kernel's docstring.
    """
    d = w2.shape[0]
    dp = pack * d
    eye = jnp.eye(pack, dtype=w1.dtype)
    wa = jnp.kron(eye, jnp.transpose(w1[:, :d]))                       # (dp, dp)
    wb = jnp.concatenate(
        [jnp.kron(eye, jnp.transpose(w1[:, d:])),                      # x2 -> h1
         jnp.kron(eye, jnp.transpose(w2))], axis=1)                    # x2 -> h2   (dp, 2dp)
    b1p = jnp.tile(b1, pack).reshape(1, dp)
    grp = jnp.arange(dp) // d
    seg = (grp[:, None] == grp[None, :]).astype(jnp.float32)           # (dp, dp)
    return wa, wb, b1p, seg


def gbp_forward(x1, x2, wa, wb, b1p, seg, *, pack, tile_m=None):
    """x1, x2: (B, S, D). (wa, wb, b1p, seg) from prepare_gbp_params. Returns (x1_rep, x2_rep)."""
    B, S, D = x1.shape
    M = B * S
    assert M % pack == 0, "row count must be divisible by the packing factor"
    Mp = M // pack
    dp = pack * D
    assert wa.shape == (dp, dp) and wb.shape == (dp, 2 * dp)
    assert b1p.shape == (1, dp) and seg.shape == (dp, dp)

    # Free, contiguous lane-packing views (no data movement, no HBM pass).
    x1p = x1.reshape(Mp, dp)
    x2p = x2.reshape(Mp, dp)

    # Row tiling: ~1024 packed rows (= 4096 original rows, ~2 MB per step) so the fixed
    # ~0.35 us per-step pipeline overhead is amortised; keep >= 4 grid steps so each v7x
    # TensorCore still has >= 2 steps to double-buffer under the "parallel" axis.
    if tile_m is None:
        if Mp <= 8:
            tile_m = Mp
        else:
            target = 1024
            steps = max(4, pl.cdiv(Mp, target))
            tile_m = min(Mp, max(8, ((pl.cdiv(Mp, steps) + 7) // 8) * 8))
    grid_m = pl.cdiv(Mp, tile_m)

    itemsize = jnp.dtype(x1.dtype).itemsize
    cost = pl.CostEstimate(
        flops=2 * Mp * dp * (dp + 2 * dp + dp),            # wa dot + wb dot + segment-sum dot
        transcendentals=3 * Mp * dp,                       # sqrt + reciprocal + tanh
        bytes_accessed=itemsize * 4 * Mp * dp
        + 4 * (dp * dp * 2 + dp * 2 * dp + dp),
    )

    row_spec = pl.BlockSpec((tile_m, dp), lambda i: (i, 0))
    out_spec = pl.BlockSpec((tile_m, dp), lambda i: (i, 0))
    wa_spec = pl.BlockSpec((dp, dp), lambda i: (0, 0))       # resident (tiny)
    wb_spec = pl.BlockSpec((dp, 2 * dp), lambda i: (0, 0))
    b_spec = pl.BlockSpec((1, dp), lambda i: (0, 0))
    seg_spec = pl.BlockSpec((dp, dp), lambda i: (0, 0))

    o1p, o2p = pl.pallas_call(
        gbp_kernel,
        out_shape=(jax.ShapeDtypeStruct((Mp, dp), x1.dtype),
                   jax.ShapeDtypeStruct((Mp, dp), x1.dtype)),
        grid_spec=pltpu.PrefetchScalarGridSpec(
            num_scalar_prefetch=0,
            grid=(grid_m,),
            in_specs=[row_spec, row_spec, wa_spec, wb_spec, b_spec, seg_spec],
            out_specs=[out_spec, out_spec],
        ),
        compiler_params=pltpu.CompilerParams(
            dimension_semantics=("parallel",),
            vmem_limit_bytes=32 * 1024 * 1024,
        ),
        cost_estimate=cost,
    )(x1p, x2p, wa, wb, b1p, seg)

    # Free contiguous reshapes back to (B, S, D) -- no lane slicing, no row slicing.
    x1_rep = o1p.reshape(B, S, D)
    x2_rep = o2p.reshape(B, S, D)
    return x1_rep, x2_rep


def gbp_reference(x1, x2, w1, b1, w2):
    """Pure-JAX reference mirroring the PyTorch forward."""
    merged = jnp.concatenate([x1, x2], axis=-1)
    h1 = merged @ w1.T + b1
    o1 = jnp.where(h1 > 0, h1, 0.1 * h1)
    h2 = x2 @ w2.T
    norm = jnp.sqrt(jnp.sum(h2 ** 2, axis=-1, keepdims=True)) + 1e-8
    o2 = h2 * jnp.tanh(h2 / norm)
    return o1, o2


if __name__ == "__main__":
    B, S, D = 2, 8, 32   # batch=2, seq=8, d_input=32 (bottleneck=1)
    key = jax.random.PRNGKey(0)
    k1, k2, k3, k4, k5 = jax.random.split(key, 5)

    x1 = jax.random.normal(k1, (B, S, D), dtype=jnp.float32)
    x2 = jax.random.normal(k2, (B, S, D), dtype=jnp.float32)

    # Deterministic params (PyTorch nn.Linear layout: weight is (out, in)).
    w1 = jax.random.normal(k3, (D, 2 * D), dtype=jnp.float32) * 0.05
    b1 = jax.random.normal(k4, (D,), dtype=jnp.float32) * 0.05
    w2 = jax.random.normal(k5, (D, D), dtype=jnp.float32) * 0.05

    M = B * S
    pack = choose_pack(M, D)                       # 4 for D=32
    params = prepare_gbp_params(w1, b1, w2, pack)  # one-time packing (load time)

    o1, o2 = gbp_forward(x1, x2, *params, pack=pack)
    jax.block_until_ready((o1, o2))

    r1, r2 = gbp_reference(x1, x2, w1, b1, w2)
    assert o1.shape == (B, S, D) and o2.shape == (B, S, D)
    assert jnp.allclose(o1, r1, atol=1e-5, rtol=1e-5), float(jnp.max(jnp.abs(o1 - r1)))
    assert jnp.allclose(o2, r2, atol=1e-5, rtol=1e-5), float(jnp.max(jnp.abs(o2 - r2)))

    print("KERNEL_OK")
</pallas_src>

<mosaic_0001>
module attributes {stable_mosaic.version = 11 : i64} {
  func.func @gbp_kernel(%arg0: i32, %arg1: memref<4x128xf32, #tpu.memory_space<vmem>>, %arg2: memref<4x128xf32, #tpu.memory_space<vmem>>, %arg3: memref<128x128xf32, #tpu.memory_space<vmem>>, %arg4: memref<128x256xf32, #tpu.memory_space<vmem>>, %arg5: memref<1x128xf32, #tpu.memory_space<vmem>>, %arg6: memref<128x128xf32, #tpu.memory_space<vmem>>, %arg7: memref<4x128xf32, #tpu.memory_space<vmem>>, %arg8: memref<4x128xf32, #tpu.memory_space<vmem>>) attributes {dimension_semantics = [#tpu.dimension_semantics<parallel>], iteration_bounds = array<i64: 1>, scalar_prefetch = 0 : i64, scratch_operands = 0 : i64, tpu.core_type = #tpu.core_type<tc>, window_params = [{transform_indices = @transform_0, window_bounds = array<i64: 4, 128>}, {transform_indices = @transform_1, window_bounds = array<i64: 4, 128>}, {pipeline_mode = #tpu.pipeline_mode<synchronous>, transform_indices = @transform_2, window_bounds = array<i64: 128, 128>}, {pipeline_mode = #tpu.pipeline_mode<synchronous>, transform_indices = @transform_3, window_bounds = array<i64: 128, 256>}, {pipeline_mode = #tpu.pipeline_mode<synchronous>, transform_indices = @transform_4, window_bounds = array<i64: 1, 128>}, {pipeline_mode = #tpu.pipeline_mode<synchronous>, transform_indices = @transform_5, window_bounds = array<i64: 128, 128>}, {transform_indices = @transform_6, window_bounds = array<i64: 4, 128>}, {transform_indices = @transform_7, window_bounds = array<i64: 4, 128>}]} {
    %c0 = arith.constant 0 : index
    %c0_0 = arith.constant 0 : index
    %0 = vector.load %arg2[%c0, %c0_0] : memref<4x128xf32, #tpu.memory_space<vmem>>, vector<4x128xf32>
    %c0_1 = arith.constant 0 : index
    %c0_2 = arith.constant 0 : index
    %1 = vector.load %arg4[%c0_1, %c0_2] : memref<128x256xf32, #tpu.memory_space<vmem>>, vector<128x256xf32>
    %cst = arith.constant dense<0.000000e+00> : vector<4x256xf32>
    %2 = tpu.matmul %0, %1, %cst {dimension_numbers = #tpu.dot_dimension_numbers<[1], [0], [0], [1], [0, 0, 1, 1], [], []>} : vector<4x128xf32>, vector<128x256xf32>, vector<4x256xf32> -> vector<4x256xf32>
    %c0_3 = arith.constant 0 : index
    %c0_4 = arith.constant 0 : index
    %3 = vector.load %arg1[%c0_3, %c0_4] : memref<4x128xf32, #tpu.memory_space<vmem>>, vector<4x128xf32>
    %c0_5 = arith.constant 0 : index
    %c0_6 = arith.constant 0 : index
    %4 = vector.load %arg3[%c0_5, %c0_6] : memref<128x128xf32, #tpu.memory_space<vmem>>, vector<128x128xf32>
    %cst_7 = arith.constant dense<0.000000e+00> : vector<4x128xf32>
    %5 = tpu.matmul %3, %4, %cst_7 {dimension_numbers = #tpu.dot_dimension_numbers<[1], [0], [0], [1], [0, 0, 1, 1], [], []>} : vector<4x128xf32>, vector<128x128xf32>, vector<4x128xf32> -> vector<4x128xf32>
    %6 = vector.extract_strided_slice %2 {offsets = [0, 0], sizes = [4, 128], strides = [1, 1]} : vector<4x256xf32> to vector<4x128xf32>
    %7 = arith.addf %5, %6 : vector<4x128xf32>
    %c0_8 = arith.constant 0 : index
    %c0_9 = arith.constant 0 : index
    %8 = vector.load %arg5[%c0_8, %c0_9] : memref<1x128xf32, #tpu.memory_space<vmem>>, vector<1x128xf32>
    %9 = vector.broadcast %8 : vector<1x128xf32> to vector<4x128xf32>
    %10 = arith.addf %7, %9 : vector<4x128xf32>
    %11 = vector.extract_strided_slice %2 {offsets = [0, 128], sizes = [4, 128], strides = [1, 1]} : vector<4x256xf32> to vector<4x128xf32>
    %cst_10 = arith.constant 0.000000e+00 : f32
    %12 = vector.broadcast %cst_10 : f32 to vector<4x128xf32>
    %13 = arith.cmpf ogt, %10, %12 : vector<4x128xf32>
    %cst_11 = arith.constant 1.000000e-01 : f32
    %14 = vector.broadcast %cst_11 : f32 to vector<4x128xf32>
    %15 = arith.mulf %14, %10 : vector<4x128xf32>
    %16 = arith.select %13, %10, %15 : vector<4x128xi1>, vector<4x128xf32>
    %c0_12 = arith.constant 0 : index
    %c0_13 = arith.constant 0 : index
    %17 = vector.load %arg7[%c0_12, %c0_13] : memref<4x128xf32, #tpu.memory_space<vmem>>, vector<4x128xf32>
    tpu.vector_store %arg7[%c0_12, %c0_13], %16 {strides = array<i32>} : memref<4x128xf32, #tpu.memory_space<vmem>>, vector<4x128xf32>,
    %18 = arith.mulf %11, %11 : vector<4x128xf32>
    %c0_14 = arith.constant 0 : index
    %c0_15 = arith.constant 0 : index
    %19 = vector.load %arg6[%c0_14, %c0_15] : memref<128x128xf32, #tpu.memory_space<vmem>>, vector<128x128xf32>
    %cst_16 = arith.constant dense<0.000000e+00> : vector<4x128xf32>
    %20 = tpu.matmul %18, %19, %cst_16 {dimension_numbers = #tpu.dot_dimension_numbers<[1], [0], [0], [1], [0, 0, 1, 1], [], []>} : vector<4x128xf32>, vector<128x128xf32>, vector<4x128xf32> -> vector<4x128xf32>
    %21 = math.sqrt %20 : vector<4x128xf32>
    %cst_17 = arith.constant 9.99999993E-9 : f32
    %22 = vector.broadcast %cst_17 : f32 to vector<4x128xf32>
    %23 = arith.addf %21, %22 : vector<4x128xf32>
    %24 = tpu.reciprocal %23 : vector<4x128xf32> -> vector<4x128xf32>
    %25 = arith.mulf %11, %24 : vector<4x128xf32>
    %26 = math.tanh %25 : vector<4x128xf32>
    %27 = arith.mulf %11, %26 : vector<4x128xf32>
    %c0_18 = arith.constant 0 : index
    %c0_19 = arith.constant 0 : index
    %28 = vector.load %arg8[%c0_18, %c0_19] : memref<4x128xf32, #tpu.memory_space<vmem>>, vector<4x128xf32>
    tpu.vector_store %arg8[%c0_18, %c0_19], %27 {strides = array<i32>} : memref<4x128xf32, #tpu.memory_space<vmem>>, vector<4x128xf32>,
    return
  }
  func.func @transform_0(%arg0: i32) -> (i32, i32) {
    %c0_i32 = arith.constant 0 : i32
    %c0_i32_0 = arith.constant 0 : i32
    return %arg0, %c0_i32 : i32, i32
  }
  func.func @transform_1(%arg0: i32) -> (i32, i32) {
    %c0_i32 = arith.constant 0 : i32
    %c0_i32_0 = arith.constant 0 : i32
    return %arg0, %c0_i32 : i32, i32
  }
  func.func @transform_2(%arg0: i32) -> (i32, i32) {
    %c0_i32 = arith.constant 0 : i32
    %c0_i32_0 = arith.constant 0 : i32
    %c0_i32_1 = arith.constant 0 : i32
    return %c0_i32, %c0_i32_0 : i32, i32
  }
  func.func @transform_3(%arg0: i32) -> (i32, i32) {
    %c0_i32 = arith.constant 0 : i32
    %c0_i32_0 = arith.constant 0 : i32
    %c0_i32_1 = arith.constant 0 : i32
    return %c0_i32, %c0_i32_0 : i32, i32
  }
  func.func @transform_4(%arg0: i32) -> (i32, i32) {
    %c0_i32 = arith.constant 0 : i32
    %c0_i32_0 = arith.constant 0 : i32
    %c0_i32_1 = arith.constant 0 : i32
    return %c0_i32, %c0_i32_0 : i32, i32
  }
  func.func @transform_5(%arg0: i32) -> (i32, i32) {
    %c0_i32 = arith.constant 0 : i32
    %c0_i32_0 = arith.constant 0 : i32
    %c0_i32_1 = arith.constant 0 : i32
    return %c0_i32, %c0_i32_0 : i32, i32
  }
  func.func @transform_6(%arg0: i32) -> (i32, i32) {
    %c0_i32 = arith.constant 0 : i32
    %c0_i32_0 = arith.constant 0 : i32
    return %arg0, %c0_i32 : i32, i32
  }
  func.func @transform_7(%arg0: i32) -> (i32, i32) {
    %c0_i32 = arith.constant 0 : i32
    %c0_i32_0 = arith.constant 0 : i32
    return %arg0, %c0_i32 : i32, i32
  }
}

</mosaic_0001>

<bundles_post_ra>
// kernel: tpu_custom_call.1
= control target key start
LH: loop header
LB: loop body
LE: loop exit
PB: predicated region body
PF: predicated region fallthrough
CT: control target
= control target key end

     0   :  { %13 = vsyncpa [#allocation3], 0  ;;  %s598_s0 = inlined_call_operand.hbm [shape: f32[4,128], index: 0, kind: input, shape index: {}]   ;;  %s599_s1 = inlined_call_operand.hbm [shape: f32[4,128], index: 1, kind: input, shape index: {}]   ;;  %s600_s2 = inlined_call_operand.hbm [shape: f32[128,128], index: 2, kind: input, shape index: {}]   ;;  %s601_s3 = inlined_call_operand.hbm [shape: f32[128,256], index: 3, kind: input, shape index: {}]   ;;  %s602_s4 = inlined_call_operand.vmem [shape: f32[1,128], index: 4, kind: input, shape index: {}]   ;;  %s603_s5 = inlined_call_operand.hbm [shape: f32[128,128], index: 5, kind: input, shape index: {}]   ;;  %s604_s6 = inlined_call_operand.hbm [shape: f32[4,128], index: 6, kind: output, shape index: {0}]   ;;  %s605_s7 = inlined_call_operand.hbm [shape: f32[4,128], index: 7, kind: output, shape index: {1}]  }
   0x1   :  { %14 = vsyncpa [#allocation6], 0 }
   0x2   :  { %15 = vsyncpa [#allocation9], 0 }
   0x3   :  { %16 = vsyncpa [#allocation4], 0  ;;  %s34_s26 = sshll.u32 %s599_s1, 4  ;;  %s35_s26 = int_to_ptr.hbm [resolvable:$true] %s34_s26 }
   0x4   :  { %17 = vsyncpa [#allocation13], 0  ;;  %s519_s27 = smov [#allocation5]   ;;  %s57_s8 = sshll.u32 %s601_s3, 4  ;;  %s58_s8 = int_to_ptr.hbm [resolvable:$true] %s57_s8 }
   0x5   :  { %s36_s28 = sshll.u32 %s519_s27, 4  ;;  %s520_s9 = smov [#allocation8]   ;;  %s37_s28 = int_to_ptr.vmem [resolvable:$true] %s36_s28 }
   0x6   :  { %39 = dma.hbm_to_vmem [thread:$0]  %s35_s26, 64, %s37_s28, [#allocation6]  }
   0x7   :  { %s59_s10 = sshll.u32 %s520_s9, 4  ;;  %s521_s11 = smov 256   ;;  %s60_s10 = int_to_ptr.vmem [resolvable:$true] %s59_s10 }
   0x8   :  { %s522_s12 = smov 16   ;;  %s23_s1 = sshll.u32 %s598_s0, 4  ;;  %s24_s1 = int_to_ptr.hbm [resolvable:$true] %s23_s1 }
   0x9   :  { %65 = dma.hbm_to_vmem [thread:$0]  %s58_s8, 4096, %s60_s10, [#allocation9], %s521_s11, %s521_s11, %s522_s12  }
   0xa   :  { %s523_s15 = smov [#allocation2]   ;;  %s44_s3 = sshll.u32 %s600_s2, 4  ;;  %s45_s3 = int_to_ptr.hbm [resolvable:$true] %s44_s3 }
   0xb   :  { %s25_s16 = sshll.u32 %s523_s15, 4  ;;  %s524_s19 = smov [#allocation7]   ;;  %s26_s16 = int_to_ptr.vmem [resolvable:$true] %s25_s16 }
   0xc   :  { %28 = dma.hbm_to_vmem [thread:$0]  %s24_s1, 64, %s26_s16, [#allocation3]  }
   0xd   :  { %s46_s20 = sshll.u32 %s524_s19, 4  ;;  %s525_s21 = smov 128   ;;  %s47_s20 = int_to_ptr.vmem [resolvable:$true] %s46_s20 }
   0xe   :  { %s526_s22 = smov 8   ;;  %s72_s0 = sshll.u32 %s603_s5, 4  ;;  %s73_s0 = int_to_ptr.hbm [resolvable:$true] %s72_s0 }
   0xf   :  { %52 = dma.hbm_to_vmem [thread:$0]  %s45_s3, 2048, %s47_s20, [#allocation6], %s525_s21, %s525_s21, %s526_s22  }
  0x10   :  { %s527_s25 = smov [#allocation10]  }
  0x11   :  { %s74_s26 = sshll.u32 %s527_s25, 4  ;;  %s75_s26 = int_to_ptr.vmem [resolvable:$true] %s74_s26 }
  0x12   :  { %80 = dma.hbm_to_vmem [thread:$0]  %s73_s0, 2048, %s75_s26, [#allocation9], %s525_s21, %s525_s21, %s526_s22  }
  0x13   :  { %509 = dma.done.wait [#allocation3], 64  }
  0x14   :  { %510 = vsyncadd [#allocation3], 4294967232 }
  0x15   :  { %511 = dma.done.wait [#allocation6], 2112  }
  0x16   :  { %512 = vsyncadd [#allocation6], 4294965184 }
  0x17   :  { %513 = dma.done.wait [#allocation9], 6144  }
  0x18   :  { %514 = vsyncadd [#allocation9], 4294961152  ;;  %v133_v0 = vld [vmem:[#allocation8 + $0xf8] sm:$0xff]  ;;  %v131_v1 = vld [vmem:[#allocation8 + $0xe8] sm:$0xff]  ;;  %s528_s27 = smov [#allocation11]   ;;  %s295_s8 = sshll.u32 %s604_s6, 4  ;;  %s296_s8 = int_to_ptr.hbm [resolvable:$true] %s295_s8 }
  0x19   :  { %154 = vmatpush.msra.mxu1 %v133_v0  ;;  %v129_v2 = vld [vmem:[#allocation8 + $0xd8] sm:$0xff]  ;;  %v127_v3 = vld [vmem:[#allocation8 + $0xc8] sm:$0xff]  ;;  %v235_v6 = vld [vmem:[#allocation10 + $0x70] sm:$0xff]  ;;  %s293_s28 = sshll.u32 %s528_s27, 4  ;;  %s306_s11 = sshll.u32 %s605_s7, 4  ;;  %s294_s28 = int_to_ptr.vmem [resolvable:$true] %s293_s28  ;;  %s307_s11 = int_to_ptr.hbm [resolvable:$true] %s306_s11 }
  0x1a   :  { %v236_v4 = vld [vmem:[#allocation10 + $0x78] sm:$0xff]  ;;  %v234_v7 = vld [vmem:[#allocation10 + $0x68] sm:$0xff]  ;;  %v233_v9 = vld [vmem:[#allocation10 + $0x60] sm:$0xff] }
  0x1b   :  { %155 = vmatpush.msra.mxu1 %v131_v1  ;;  %v125_v5 = vld [vmem:[#allocation8 + $0xb8] sm:$0xff]  ;;  %237 = vmatpush.msra.mxu3 %v236_v4  ;;  %v123_v8 = vld [vmem:[#allocation8 + $0xa8] sm:$0xff]  ;;  %v231_v13 = vld [vmem:[#allocation10 + $0x50] sm:$0xff] }
  0x1c   :  { %v121_v10 = vld [vmem:[#allocation8 + $0x98] sm:$0xff]  ;;  %v119_v12 = vld [vmem:[#allocation8 + $0x88] sm:$0xff]  ;;  %v229_v17 = vld [vmem:[#allocation10 + $0x40] sm:$0xff] }
  0x1d   :  { %156 = vmatpush.msra.mxu1 %v129_v2  ;;  %238 = vmatpush.msra.mxu3 %v235_v6  ;;  %v232_v11 = vld [vmem:[#allocation10 + $0x58] sm:$0xff]  ;;  %v230_v15 = vld [vmem:[#allocation10 + $0x48] sm:$0xff]  ;;  %v227_v21 = vld [vmem:[#allocation10 + $0x30] sm:$0xff] }
  0x1e   :  { %v117_v14 = vld [vmem:[#allocation8 + $0x78] sm:$0xff]  ;;  %v115_v16 = vld [vmem:[#allocation8 + $0x68] sm:$0xff]  ;;  %v225_v25 = vld [vmem:[#allocation10 + $0x20] sm:$0xff] }
  0x1f   :  { %157 = vmatpush.msra.mxu1 %v127_v3  ;;  %239 = vmatpush.msra.mxu3 %v234_v7  ;;  %v113_v18 = vld [vmem:[#allocation8 + $0x58] sm:$0xff]  ;;  %v111_v20 = vld [vmem:[#allocation8 + $0x48] sm:$0xff]  ;;  %v223_v30 = vld [vmem:[#allocation10 + $0x10] sm:$0xff] }
  0x20   :  { %v228_v19 = vld [vmem:[#allocation10 + $0x38] sm:$0xff]  ;;  %v226_v23 = vld [vmem:[#allocation10 + $0x28] sm:$0xff]  ;;  %v221_v32 = vld [vmem:[#allocation10] sm:$0xff] }
  0x21   :  { %158 = vmatpush.msra.mxu1 %v125_v5  ;;  %240 = vmatpush.msra.mxu3 %v233_v9  ;;  %v109_v22 = vld [vmem:[#allocation8 + $0x38] sm:$0xff]  ;;  %v107_v24 = vld [vmem:[#allocation8 + $0x28] sm:$0xff]  ;;  %v189_v34 = vld [vmem:[#allocation7 + $0x70] sm:$0xff] }
  0x22   :  { %v105_v26 = vld [vmem:[#allocation8 + $0x18] sm:$0xff]  ;;  %v103_v28 = vld [vmem:[#allocation8 + $0x8] sm:$0xff]  ;;  %v132_v35 = vld [vmem:[#allocation8 + $0xf0] sm:$0xff] }
  0x23   :  { %159 = vmatpush.msra.mxu1 %v123_v8  ;;  %241 = vmatpush.msra.mxu3 %v232_v11  ;;  %v224_v27 = vld [vmem:[#allocation10 + $0x18] sm:$0xff]  ;;  %v222_v31 = vld [vmem:[#allocation10 + $0x8] sm:$0xff]  ;;  %v130_v36 = vld [vmem:[#allocation8 + $0xe0] sm:$0xff] }
  0x24   :  { %v585_v29 = vld [vmem:[#allocation5] sm:$0xf]  ;;  %v188_v37 = vld [vmem:[#allocation7 + $0x68] sm:$0xff]  ;;  %134 = vmatpush.msra.mxu0 %v132_v35  ;;  %v128_v38 = vld [vmem:[#allocation8 + $0xd0] sm:$0xff] }
  0x25   :  { %160 = vmatpush.msra.mxu1 %v121_v10  ;;  %242 = vmatpush.msra.mxu3 %v231_v13  ;;  %v190_v33 = vld [vmem:[#allocation7 + $0x78] sm:$0xff]  ;;  %v187_v39 = vld [vmem:[#allocation7 + $0x60] sm:$0xff]  ;;  %v124_v42 = vld [vmem:[#allocation8 + $0xb0] sm:$0xff] }
  0x26   :  { %191 = vmatpush.msra.mxu2 %v190_v33  ;;  %135 = vmatpush.msra.mxu0 %v130_v36  ;;  %v126_v40 = vld [vmem:[#allocation8 + $0xc0] sm:$0xff]  ;;  %v186_v41 = vld [vmem:[#allocation7 + $0x58] sm:$0xff]  ;;  %v185_v43 = vld [vmem:[#allocation7 + $0x50] sm:$0xff] }
  0x27   :  { %161 = vmatpush.msra.mxu1 %v119_v12  ;;  %243 = vmatpush.msra.mxu3 %v230_v15  ;;  %v122_v44 = vld [vmem:[#allocation8 + $0xa0] sm:$0xff]  ;;  %v184_v45 = vld [vmem:[#allocation7 + $0x48] sm:$0xff]  ;;  %v120_v46 = vld [vmem:[#allocation8 + $0x90] sm:$0xff] }
  0x28   :  { %192 = vmatpush.msra.mxu2 %v189_v34  ;;  %136 = vmatpush.msra.mxu0 %v128_v38  ;;  %v183_v47 = vld [vmem:[#allocation7 + $0x40] sm:$0xff]  ;;  %v182_v49 = vld [vmem:[#allocation7 + $0x38] sm:$0xff]  ;;  %v116_v50 = vld [vmem:[#allocation8 + $0x70] sm:$0xff] }
  0x29   :  { %162 = vmatpush.msra.mxu1 %v117_v14  ;;  %244 = vmatpush.msra.mxu3 %v229_v17  ;;  %v118_v48 = vld [vmem:[#allocation8 + $0x80] sm:$0xff]  ;;  %v181_v51 = vld [vmem:[#allocation7 + $0x30] sm:$0xff]  ;;  %v180_v53 = vld [vmem:[#allocation7 + $0x28] sm:$0xff] }
  0x2a   :  { %193 = vmatpush.msra.mxu2 %v188_v37  ;;  %137 = vmatpush.msra.mxu0 %v126_v40  ;;  %v114_v52 = vld [vmem:[#allocation8 + $0x60] sm:$0xff]  ;;  %v112_v54 = vld [vmem:[#allocation8 + $0x50] sm:$0xff]  ;;  %v178_v57 = vld [vmem:[#allocation7 + $0x18] sm:$0xff] }
  0x2b   :  { %163 = vmatpush.msra.mxu1 %v115_v16  ;;  %245 = vmatpush.msra.mxu3 %v228_v19  ;;  %v179_v55 = vld [vmem:[#allocation7 + $0x20] sm:$0xff]  ;;  %v108_v58 = vld [vmem:[#allocation8 + $0x30] sm:$0xff]  ;;  %v176_v61 = vld [vmem:[#allocation7 + $0x8] sm:$0xff] }
  0x2c   :  { %194 = vmatpush.msra.mxu2 %v187_v39  ;;  %138 = vmatpush.msra.mxu0 %v124_v42  ;;  %v110_v56 = vld [vmem:[#allocation8 + $0x40] sm:$0xff]  ;;  %v177_v59 = vld [vmem:[#allocation7 + $0x10] sm:$0xff]  ;;  %v174_v1 = vld [vmem:[#allocation2] sm:$0xf] }
  0x2d   :  { %164 = vmatpush.msra.mxu1 %v113_v18  ;;  %246 = vmatpush.msra.mxu3 %v227_v21  ;;  %v106_v60 = vld [vmem:[#allocation8 + $0x20] sm:$0xff]  ;;  %v104_v62 = vld [vmem:[#allocation8 + $0x10] sm:$0xff]  ;;  %v334_v7 = vld [vmem:[%s602_s4] ss:$0 sm:$0xff]  ;;  %s529_s4 = smov [#allocation12]  }
  0x2e   :  { %195 = vmatpush.msra.mxu2 %v186_v41  ;;  %139 = vmatpush.msra.mxu0 %v122_v44  ;;  %v175_v63 = vld [vmem:[#allocation7] sm:$0xff]  ;;  %s304_s6 = sshll.u32 %s529_s4, 4  ;;  %s305_s6 = int_to_ptr.vmem [resolvable:$true] %s304_s6 }
  0x2f   :  { %165 = vmatpush.msra.mxu1 %v111_v20  ;;  %247 = vmatpush.msra.mxu3 %v226_v23  ;;  %v102_v3 = vld [vmem:[#allocation8] sm:$0xff] }
  0x30   :  { %196 = vmatpush.msra.mxu2 %v185_v43  ;;  %140 = vmatpush.msra.mxu0 %v120_v46 }
  0x31   :  { %166 = vmatpush.msra.mxu1 %v109_v22  ;;  %248 = vmatpush.msra.mxu3 %v225_v25 }
  0x32   :  { %197 = vmatpush.msra.mxu2 %v184_v45  ;;  %141 = vmatpush.msra.mxu0 %v118_v48 }
  0x33   :  { %167 = vmatpush.msra.mxu1 %v107_v24  ;;  %249 = vmatpush.msra.mxu3 %v224_v27 }
  0x34   :  { %198 = vmatpush.msra.mxu2 %v183_v47  ;;  %142 = vmatpush.msra.mxu0 %v116_v50 }
  0x35   :  { %168 = vmatpush.msra.mxu1 %v105_v26  ;;  %250 = vmatpush.msra.mxu3 %v223_v30 }
  0x36   :  { %199 = vmatpush.msra.mxu2 %v182_v49  ;;  %143 = vmatpush.msra.mxu0 %v114_v52 }
  0x37   :  { %169 = vmatpush.msra.mxu1 %v103_v28  ;;  %251 = vmatpush.msra.mxu3 %v222_v31 }
  0x38   :  { %170 = vmatmul.f32.vlgmr.msra.gmra.mxu1 %v585_v29  ;;  %200 = vmatpush.msra.mxu2 %v181_v51 }
  0x39   :  { %252 = vmatpush.msra.mxu3 %v221_v32  ;;  %144 = vmatpush.msra.mxu0 %v112_v54 }
  0x3a   :  { %201 = vmatpush.msra.mxu2 %v180_v53 }
  0x3b   :  { %145 = vmatpush.msra.mxu0 %v110_v56 }
  0x3c   :  { %202 = vmatpush.msra.mxu2 %v179_v55 }
  0x3d   :  { %146 = vmatpush.msra.mxu0 %v108_v58 }
  0x3e   :  { %203 = vmatpush.msra.mxu2 %v178_v57 }
  0x3f   :  { %147 = vmatpush.msra.mxu0 %v106_v60 }
  0x40   :  { %204 = vmatpush.msra.mxu2 %v177_v59 }
  0x41   :  { %148 = vmatpush.msra.mxu0 %v104_v62 }
  0x42   :  { %205 = vmatpush.msra.mxu2 %v176_v61 }
  0x43   :  { %149 = vmatpush.msra.mxu0 %v102_v3 }
  0x44   :  { %206 = vmatpush.msra.mxu2 %v175_v63  ;;  %150 = vmatmul.f32.vlgmr.msra.gmra.mxu0 %v585_v29 }
  0x45   :  { %207 = vmatmul.f32.vlgmr.msra.gmra.mxu2 %v174_v1 }
  0xb5   :  { %v171_v0 = vpop.f32.mrf.mxu1 }
  0xb6   :  { %v220_v2 = vmul.f32 %v171_v0, %v171_v0 }
  0xb8   :  { %253 = vmatmul.f32.vlgmr.msra.gmra.mxu3 %v220_v2 }
  0xc1   :  { %v151_v4 = vpop.f32.mrf.mxu0 }
  0xc8   :  { %v208_v6 = vpop.f32.mrf.mxu2 }
  0xc9   :  { %v209_v8 = vadd.f32 %v208_v6, %v151_v4 }
  0xcb   :  { %v215_v9 = vadd.f32 %v334_v7, %v209_v8 }
  0xcd   :  { %v217_v10 = vmul.f32 0.1, %v215_v9  ;;  %vm216_vm0 = vcmp.gt.f32.partialorder %v215_v9, 0.0 }
  0xcf   :  { %v218_v13 = vsel %vm216_vm0, %v215_v9, %v217_v10 }
  0xd0   :  { %219 = vst [vmem:[#allocation11] sm:$0xf] %v218_v13 }
  0xd1   :  { %298 = dma.vmem_to_hbm [thread:$0]  %s294_s28, 64, %s296_s8, [#allocation4]  }
 0x13b   :  { %v254_v5 = vpop.f32.mrf.mxu3 }
 0x13c   :  { %335 = vrsqrt.f32 %v254_v5  ;;  %vm264_vm1 = vcmp.eq.f32.partialorder %v254_v5, inf  ;;  %v267_v19 = vand.u32 2147483648, %v254_v5  ;;  %vm266_vm2 = vcmp.eq.f32.partialorder %v254_v5, 0.0 }
 0x142   :  { %v336_v11 = vpop.eup %335 }
 0x143   :  { %v258_v12 = vmul.f32 %v336_v11, %v254_v5 }
 0x145   :  { %v259_v14 = vmul.f32 %v336_v11, %v258_v12 }
 0x147   :  { %v260_v15 = vmul.f32 0.5, %v259_v14 }
 0x149   :  { %v261_v16 = vsub.f32 1.5, %v260_v15 }
 0x14b   :  { %v262_v17 = vmul.f32 %v336_v11, %v261_v16 }
 0x14d   :  { %v263_v18 = vmul.f32 %v262_v17, %v254_v5 }
 0x14f   :  { %v265_v20 = vsel %vm264_vm1, %v254_v5, %v263_v18 }
 0x150   :  { %v268_v21 = vsel %vm266_vm2, %v267_v19, %v265_v20 }
 0x151   :  { %v269_v22 = vadd.f32 1e-08, %v268_v21 }
 0x153   :  { %337 = vrcp.f32 %v269_v22  ;;  %v281_v26 = vand.u32 2147483648, %v269_v22  ;;  %v279_v28 = vand.u32 2147483647, %v269_v22  ;;  %vm275_vm4 = vweird.f32 %v269_v22 }
 0x155   :  { %v282_v30 = vor.u32 1.1754944e-38, %v281_v26  ;;  %vm280_vm6 = vcmp.eq.f32.partialorder %v279_v28, 8.507059e+37 }
 0x159   :  { %v338_v23 = vpop.eup %337 }
 0x15a   :  { %v271_v24 = vmul.f32 %v338_v23, %v269_v22  ;;  %vm276_vm3 = vweird.f32 %v338_v23 }
 0x15b   :  { %vm277_vm5 = vmor %vm275_vm4, %vm276_vm3 }
 0x15c   :  { %v272_v25 = vsub.f32 1.0, %v271_v24 }
 0x15e   :  { %v273_v27 = vmul.f32 %v338_v23, %v272_v25 }
 0x160   :  { %v274_v29 = vadd.f32 %v338_v23, %v273_v27 }
 0x162   :  { %v278_v31 = vsel %vm277_vm5, %v338_v23, %v274_v29 }
 0x163   :  { %v283_v32 = vsel %vm280_vm6, %v282_v30, %v278_v31 }
 0x164   :  { %v284_v33 = vmul.f32 %v283_v32, %v171_v0 }
 0x166   :  { %339 = vtanh.f32 %v284_v33 }
 0x16c   :  { %v340_v34 = vpop.eup %339 }
 0x16d   :  { %v286_v35 = vmul.f32 %v340_v34, %v171_v0 }
 0x16f   :  { %287 = vst [vmem:[#allocation12] sm:$0xf] %v286_v35 }
 0x170   :  { %309 = dma.vmem_to_hbm [thread:$0]  %s305_s6, 64, %s307_s11, [#allocation13]  }
 0x171   :  { %515 = dma.done.wait [#allocation4], 64  }
 0x172   :  { %516 = vsyncadd [#allocation4], 4294967232 }
 0x173   :  { %517 = dma.done.wait [#allocation13], 64  }
 0x174   :  { %518 = vsyncadd [#allocation13], 4294967232 }
 0x175   :  { %318 = vsyncpa [#allocation3], 1 }
 0x176   :  { %319 = vsyncpa [#allocation6], 1 }
 0x177   :  { %320 = vsyncpa [#allocation9], 1 }
 0x178   :  { %321 = vsyncpa [#allocation4], 1 }
 0x179   :  { %322 = vsyncpa [#allocation13], 1 }

</bundles_post_ra>
